<compile_context>
chip_gen: v6e
topology: v6e:2x2x1
jax: 0.10.0
libtpu: 0.0.40
codegen_flags: <defaults>
</compile_context>

<pallas_src>
import jax
import jax.numpy as jnp
from jax import lax
from jax.experimental import pallas as pl
from jax.experimental.pallas import tpu as pltpu


def _round_up(x, m):
    return (x + m - 1) * m // m if False else ((x + m - 1) // m) * m


def _criticality_rnn_kernel(
    x_ref,      # (T_blk*Bp, D)   time-major inputs for this time-block
    h0_ref,     # (Bp, Hp)        initial hidden state (learned, padded)
    wih_ref,    # (D, Hp)         input->hidden weight (pre-transposed, padded)
    whh_ref,    # (Hp, Hp)        hidden->hidden weight (pre-transposed, padded)
    b_ref,      # (1, Hp)         folded b_ih + b_hh (padded with zeros)
    wc_ref,     # (Hp, Cp)        classification head weight (padded)
    bc_ref,     # (1, Cp)         class bias; padded classes set to -1e30
    out_ref,    # (T_blk*Bp, Cp)  log-softmax class predictions
    h_ref,      # scratch (Bp, Hp): hidden state persisting across grid steps
    act_ref,    # scratch (T_blk*Bp, Hp): pre-activations, then hidden states
):
    bp = h_ref.shape[0]
    t_blk = act_ref.shape[0] // bp

    # First time-block: load the (learned) initial hidden state.
    @pl.when(pl.program_id(0) == 0)
    def _():
        h_ref[...] = h0_ref[...]

    # Phase 1: batched input projection, one big MXU matmul (off the serial
    # path). Folded bias added here once.
    act_ref[...] = (
        jnp.dot(x_ref[...], wih_ref[...], preferred_element_type=jnp.float32)
        + b_ref[...]
    )

    # Phase 2: serial recurrence — only h @ W_hh + add + tanh per step.
    whh = whh_ref[...]

    def step(t, h):
        r = pl.multiple_of(t * bp, bp)
        pre = act_ref[pl.ds(r, bp), :] + jnp.dot(
            h, whh, preferred_element_type=jnp.float32
        )
        h_new = jnp.tanh(pre)
        act_ref[pl.ds(r, bp), :] = h_new   # overwrite pre-activation with h_t
        return h_new

    h_last = lax.fori_loop(0, t_blk, step, h_ref[...], unroll=True)
    h_ref[...] = h_last

    # Phase 3: batched classification head + numerically-stable log-softmax,
    # single lane-dense store. Padded classes carry a -1e30 bias so they do
    # not contribute to the reduction.
    logits = (
        jnp.dot(act_ref[...], wc_ref[...], preferred_element_type=jnp.float32)
        + bc_ref[...]
    )
    m = jnp.max(logits, axis=-1, keepdims=True)
    lse = m + jnp.log(jnp.sum(jnp.exp(logits - m), axis=-1, keepdims=True))
    out_ref[...] = (logits - lse).astype(out_ref.dtype)


def criticality_rnn_forward(x, params, *, t_blk=8):
    """x: (batch, seq, in_features) float32 -> (batch, seq, num_classes) log-probs."""
    B, T, D = x.shape
    H = params["w_hh"].shape[0]
    C = params["w_cls"].shape[0]

    Bp = _round_up(B, 8)        # sublane multiple
    Hp = _round_up(H, 128)      # lane multiple
    Cp = _round_up(C, 128)      # lane multiple (lane-dense output store)
    Tp = _round_up(T, t_blk)

    # Time-major, batch padded, flattened to (Tp*Bp, D). Row t*Bp + b = (t, b).
    x_tm = jnp.transpose(x, (1, 0, 2)).astype(jnp.float32)        # (T, B, D)
    x_tm = jnp.pad(x_tm, ((0, Tp - T), (0, Bp - B), (0, 0)))
    x2d = x_tm.reshape(Tp * Bp, D)

    # Pre-transpose PyTorch-convention (out, in) weights to (in, out) and pad.
    wih = jnp.zeros((D, Hp), jnp.float32).at[:, :H].set(params["w_ih"].T)
    whh = jnp.zeros((Hp, Hp), jnp.float32).at[:H, :H].set(params["w_hh"].T)
    b = jnp.zeros((1, Hp), jnp.float32).at[:, :H].set(
        (params["b_ih"] + params["b_hh"]).reshape(1, H))           # folded bias
    wc = jnp.zeros((Hp, Cp), jnp.float32).at[:H, :C].set(params["w_cls"].T)
    bc = jnp.full((1, Cp), -1e30, jnp.float32).at[:, :C].set(
        params["b_cls"].reshape(1, C))
    h0 = jnp.zeros((Bp, Hp), jnp.float32).at[:B, :H].set(
        jnp.broadcast_to(params["h0"], (B, H)))

    n_t = Tp // t_blk

    out2d = pl.pallas_call(
        _criticality_rnn_kernel,
        out_shape=jax.ShapeDtypeStruct((Tp * Bp, Cp), jnp.float32),
        grid=(n_t,),
        in_specs=[
            pl.BlockSpec((t_blk * Bp, D), lambda i: (i, 0)),   # x: pipelined over T
            pl.BlockSpec((Bp, Hp), lambda i: (0, 0)),          # h0 (resident)
            pl.BlockSpec((D, Hp), lambda i: (0, 0)),           # W_ih^T (resident)
            pl.BlockSpec((Hp, Hp), lambda i: (0, 0)),          # W_hh^T (resident)
            pl.BlockSpec((1, Hp), lambda i: (0, 0)),           # folded bias
            pl.BlockSpec((Hp, Cp), lambda i: (0, 0)),          # W_cls^T (resident)
            pl.BlockSpec((1, Cp), lambda i: (0, 0)),           # class bias
        ],
        out_specs=pl.BlockSpec((t_blk * Bp, Cp), lambda i: (i, 0)),
        scratch_shapes=[
            pltpu.VMEM((Bp, Hp), jnp.float32),            # persistent hidden state
            pltpu.VMEM((t_blk * Bp, Hp), jnp.float32),    # pre-activations / h_t slab
        ],
        compiler_params=pltpu.CompilerParams(
            dimension_semantics=("arbitrary",),            # recurrence is sequential
        ),
    )(x2d, h0, wih, whh, b, wc, bc)

    out = out2d.reshape(Tp, Bp, Cp)[:T, :B, :C]   # strip time/batch/class padding
    return jnp.transpose(out, (1, 0, 2))          # (B, T, C)


def _reference_forward(x, params):
    """Pure-JAX reference matching PyTorch nn.RNN + Linear + LogSoftmax(dim=2)."""
    B, T, D = x.shape
    H = params["w_hh"].shape[0]
    h = jnp.broadcast_to(params["h0"], (B, H))

    def scan_step(h, x_t):
        h_new = jnp.tanh(
            x_t @ params["w_ih"].T + params["b_ih"]
            + h @ params["w_hh"].T + params["b_hh"]
        )
        return h_new, h_new

    _, hs = lax.scan(scan_step, h, jnp.transpose(x, (1, 0, 2)))  # (T, B, H)
    hs = jnp.transpose(hs, (1, 0, 2))                            # (B, T, H)
    logits = hs @ params["w_cls"].T + params["b_cls"]            # (B, T, C)
    return jax.nn.log_softmax(logits, axis=2)


def init_params(key, in_features, num_hidden_units, num_classes,
                learn_hidden_init=True):
    """Deterministic synthetic parameter init (PyTorch-style uniform bounds)."""
    ks = jax.random.split(key, 8)
    bound_rnn = 1.0 / jnp.sqrt(num_hidden_units)
    bound_cls = 1.0 / jnp.sqrt(num_hidden_units)
    u = lambda k, shape, b: jax.random.uniform(
        k, shape, dtype=jnp.float32, minval=-b, maxval=b)
    params = {
        "w_ih": u(ks[0], (num_hidden_units, in_features), bound_rnn),
        "w_hh": u(ks[1], (num_hidden_units, num_hidden_units), bound_rnn),
        "b_ih": u(ks[2], (num_hidden_units,), bound_rnn),
        "b_hh": u(ks[3], (num_hidden_units,), bound_rnn),
        "w_cls": u(ks[4], (num_classes, num_hidden_units), bound_cls),
        "b_cls": u(ks[5], (num_classes,), bound_cls),
        "h0": (u(ks[6], (1, num_hidden_units), bound_rnn)
               if learn_hidden_init
               else jnp.zeros((1, num_hidden_units), jnp.float32)),
    }
    return params


if __name__ == "__main__":
    # Small shapes implied by the forward pass: x is (batch, seq, in_features).
    B, T, D = 2, 8, 16
    H, C = 32, 4

    key = jax.random.PRNGKey(0)
    k_x, k_p = jax.random.split(key)
    x = jax.random.normal(k_x, (B, T, D), dtype=jnp.float32)
    params = init_params(k_p, D, H, C, learn_hidden_init=True)

    out = criticality_rnn_forward(x, params)
    out = jax.block_until_ready(out)

    ref = _reference_forward(x, params)
    assert out.shape == (B, T, C), out.shape
    assert jnp.allclose(out, ref, atol=1e-4, rtol=1e-4), (
        float(jnp.max(jnp.abs(out - ref))))
    # log-softmax sanity: probabilities sum to 1 along class axis
    assert jnp.allclose(jnp.sum(jnp.exp(out), axis=2), 1.0, atol=1e-4)

    print("KERNEL_OK")
</pallas_src>

<mosaic_0001>
module attributes {stable_mosaic.version = 11 : i64} {
  func.func @_criticality_rnn_kernel(%arg0: i32, %arg1: memref<64x16xf32, #tpu.memory_space<vmem>>, %arg2: memref<8x128xf32, #tpu.memory_space<vmem>>, %arg3: memref<16x128xf32, #tpu.memory_space<vmem>>, %arg4: memref<128x128xf32, #tpu.memory_space<vmem>>, %arg5: memref<1x128xf32, #tpu.memory_space<vmem>>, %arg6: memref<128x128xf32, #tpu.memory_space<vmem>>, %arg7: memref<1x128xf32, #tpu.memory_space<vmem>>, %arg8: memref<64x128xf32, #tpu.memory_space<vmem>>, %arg9: memref<8x128xf32, #tpu.memory_space<vmem>>, %arg10: memref<64x128xf32, #tpu.memory_space<vmem>>) attributes {dimension_semantics = [#tpu.dimension_semantics<arbitrary>], iteration_bounds = array<i64: 1>, scalar_prefetch = 0 : i64, scratch_operands = 2 : i64, tpu.core_type = #tpu.core_type<tc>, window_params = [{transform_indices = @transform_0, window_bounds = array<i64: 64, 16>}, {pipeline_mode = #tpu.pipeline_mode<synchronous>, transform_indices = @transform_1, window_bounds = array<i64: 8, 128>}, {pipeline_mode = #tpu.pipeline_mode<synchronous>, transform_indices = @transform_2, window_bounds = array<i64: 16, 128>}, {pipeline_mode = #tpu.pipeline_mode<synchronous>, transform_indices = @transform_3, window_bounds = array<i64: 128, 128>}, {pipeline_mode = #tpu.pipeline_mode<synchronous>, transform_indices = @transform_4, window_bounds = array<i64: 1, 128>}, {pipeline_mode = #tpu.pipeline_mode<synchronous>, transform_indices = @transform_5, window_bounds = array<i64: 128, 128>}, {pipeline_mode = #tpu.pipeline_mode<synchronous>, transform_indices = @transform_6, window_bounds = array<i64: 1, 128>}, {transform_indices = @transform_7, window_bounds = array<i64: 64, 128>}]} {
    %c0_i32 = arith.constant 0 : i32
    %0 = arith.cmpi eq, %arg0, %c0_i32 : i32
    %1 = arith.extui %0 : i1 to i32
    %c0_i32_0 = arith.constant 0 : i32
    %2 = arith.cmpi ne, %1, %c0_i32_0 : i32
    scf.if %2 {
      %c0_58 = arith.constant 0 : index
      %c0_59 = arith.constant 0 : index
      %103 = vector.load %arg2[%c0_58, %c0_59] : memref<8x128xf32, #tpu.memory_space<vmem>>, vector<8x128xf32>
      %c0_60 = arith.constant 0 : index
      %c0_61 = arith.constant 0 : index
      %104 = vector.load %arg9[%c0_60, %c0_61] : memref<8x128xf32, #tpu.memory_space<vmem>>, vector<8x128xf32>
      tpu.vector_store %arg9[%c0_60, %c0_61], %103 {strides = array<i32>} : memref<8x128xf32, #tpu.memory_space<vmem>>, vector<8x128xf32>,
    } else {
    }
    %c0 = arith.constant 0 : index
    %c0_1 = arith.constant 0 : index
    %3 = vector.load %arg1[%c0, %c0_1] : memref<64x16xf32, #tpu.memory_space<vmem>>, vector<64x16xf32>
    %c0_2 = arith.constant 0 : index
    %c0_3 = arith.constant 0 : index
    %4 = vector.load %arg3[%c0_2, %c0_3] : memref<16x128xf32, #tpu.memory_space<vmem>>, vector<16x128xf32>
    %cst = arith.constant dense<0.000000e+00> : vector<64x128xf32>
    %5 = tpu.matmul %3, %4, %cst {dimension_numbers = #tpu.dot_dimension_numbers<[1], [0], [0], [1], [0, 0, 1, 1], [], []>} : vector<64x16xf32>, vector<16x128xf32>, vector<64x128xf32> -> vector<64x128xf32>
    %c0_4 = arith.constant 0 : index
    %c0_5 = arith.constant 0 : index
    %6 = vector.load %arg5[%c0_4, %c0_5] : memref<1x128xf32, #tpu.memory_space<vmem>>, vector<1x128xf32>
    %7 = vector.broadcast %6 : vector<1x128xf32> to vector<64x128xf32>
    %8 = arith.addf %5, %7 : vector<64x128xf32>
    %c0_6 = arith.constant 0 : index
    %c0_7 = arith.constant 0 : index
    %9 = vector.load %arg10[%c0_6, %c0_7] : memref<64x128xf32, #tpu.memory_space<vmem>>, vector<64x128xf32>
    tpu.vector_store %arg10[%c0_6, %c0_7], %8 {strides = array<i32>} : memref<64x128xf32, #tpu.memory_space<vmem>>, vector<64x128xf32>,
    %c0_8 = arith.constant 0 : index
    %c0_9 = arith.constant 0 : index
    %10 = vector.load %arg4[%c0_8, %c0_9] : memref<128x128xf32, #tpu.memory_space<vmem>>, vector<128x128xf32>
    %c0_10 = arith.constant 0 : index
    %c0_11 = arith.constant 0 : index
    %11 = vector.load %arg9[%c0_10, %c0_11] : memref<8x128xf32, #tpu.memory_space<vmem>>, vector<8x128xf32>
    %c0_i32_12 = arith.constant 0 : i32
    %c8_i32 = arith.constant 8 : i32
    %12 = arith.muli %c0_i32_12, %c8_i32 : i32
    %13 = tpu.assume_multiple %12, 8 : i32
    %14 = arith.index_cast %13 : i32 to index
    %c0_13 = arith.constant 0 : index
    %15 = vector.load %arg10[%14, %c0_13] : memref<64x128xf32, #tpu.memory_space<vmem>>, vector<8x128xf32>
    %cst_14 = arith.constant dense<0.000000e+00> : vector<8x128xf32>
    %16 = tpu.matmul %11, %10, %cst_14 {dimension_numbers = #tpu.dot_dimension_numbers<[1], [0], [0], [1], [0, 0, 1, 1], [], []>} : vector<8x128xf32>, vector<128x128xf32>, vector<8x128xf32> -> vector<8x128xf32>
    %17 = arith.addf %15, %16 : vector<8x128xf32>
    %18 = math.tanh %17 : vector<8x128xf32>
    %19 = arith.index_cast %13 : i32 to index
    %c0_15 = arith.constant 0 : index
    %20 = vector.load %arg10[%19, %c0_15] : memref<64x128xf32, #tpu.memory_space<vmem>>, vector<8x128xf32>
    tpu.vector_store %arg10[%19, %c0_15], %18 {strides = array<i32>} : memref<64x128xf32, #tpu.memory_space<vmem>>, vector<8x128xf32>,
    %c1_i32 = arith.constant 1 : i32
    %c8_i32_16 = arith.constant 8 : i32
    %21 = arith.muli %c1_i32, %c8_i32_16 : i32
    %22 = tpu.assume_multiple %21, 8 : i32
    %23 = arith.index_cast %22 : i32 to index
    %c0_17 = arith.constant 0 : index
    %24 = vector.load %arg10[%23, %c0_17] : memref<64x128xf32, #tpu.memory_space<vmem>>, vector<8x128xf32>
    %cst_18 = arith.constant dense<0.000000e+00> : vector<8x128xf32>
    %25 = tpu.matmul %18, %10, %cst_18 {dimension_numbers = #tpu.dot_dimension_numbers<[1], [0], [0], [1], [0, 0, 1, 1], [], []>} : vector<8x128xf32>, vector<128x128xf32>, vector<8x128xf32> -> vector<8x128xf32>
    %26 = arith.addf %24, %25 : vector<8x128xf32>
    %27 = math.tanh %26 : vector<8x128xf32>
    %28 = arith.index_cast %22 : i32 to index
    %c0_19 = arith.constant 0 : index
    %29 = vector.load %arg10[%28, %c0_19] : memref<64x128xf32, #tpu.memory_space<vmem>>, vector<8x128xf32>
    tpu.vector_store %arg10[%28, %c0_19], %27 {strides = array<i32>} : memref<64x128xf32, #tpu.memory_space<vmem>>, vector<8x128xf32>,
    %c2_i32 = arith.constant 2 : i32
    %c8_i32_20 = arith.constant 8 : i32
    %30 = arith.muli %c2_i32, %c8_i32_20 : i32
    %31 = tpu.assume_multiple %30, 8 : i32
    %32 = arith.index_cast %31 : i32 to index
    %c0_21 = arith.constant 0 : index
    %33 = vector.load %arg10[%32, %c0_21] : memref<64x128xf32, #tpu.memory_space<vmem>>, vector<8x128xf32>
    %cst_22 = arith.constant dense<0.000000e+00> : vector<8x128xf32>
    %34 = tpu.matmul %27, %10, %cst_22 {dimension_numbers = #tpu.dot_dimension_numbers<[1], [0], [0], [1], [0, 0, 1, 1], [], []>} : vector<8x128xf32>, vector<128x128xf32>, vector<8x128xf32> -> vector<8x128xf32>
    %35 = arith.addf %33, %34 : vector<8x128xf32>
    %36 = math.tanh %35 : vector<8x128xf32>
    %37 = arith.index_cast %31 : i32 to index
    %c0_23 = arith.constant 0 : index
    %38 = vector.load %arg10[%37, %c0_23] : memref<64x128xf32, #tpu.memory_space<vmem>>, vector<8x128xf32>
    tpu.vector_store %arg10[%37, %c0_23], %36 {strides = array<i32>} : memref<64x128xf32, #tpu.memory_space<vmem>>, vector<8x128xf32>,
    %c3_i32 = arith.constant 3 : i32
    %c8_i32_24 = arith.constant 8 : i32
    %39 = arith.muli %c3_i32, %c8_i32_24 : i32
    %40 = tpu.assume_multiple %39, 8 : i32
    %41 = arith.index_cast %40 : i32 to index
    %c0_25 = arith.constant 0 : index
    %42 = vector.load %arg10[%41, %c0_25] : memref<64x128xf32, #tpu.memory_space<vmem>>, vector<8x128xf32>
    %cst_26 = arith.constant dense<0.000000e+00> : vector<8x128xf32>
    %43 = tpu.matmul %36, %10, %cst_26 {dimension_numbers = #tpu.dot_dimension_numbers<[1], [0], [0], [1], [0, 0, 1, 1], [], []>} : vector<8x128xf32>, vector<128x128xf32>, vector<8x128xf32> -> vector<8x128xf32>
    %44 = arith.addf %42, %43 : vector<8x128xf32>
    %45 = math.tanh %44 : vector<8x128xf32>
    %46 = arith.index_cast %40 : i32 to index
    %c0_27 = arith.constant 0 : index
    %47 = vector.load %arg10[%46, %c0_27] : memref<64x128xf32, #tpu.memory_space<vmem>>, vector<8x128xf32>
    tpu.vector_store %arg10[%46, %c0_27], %45 {strides = array<i32>} : memref<64x128xf32, #tpu.memory_space<vmem>>, vector<8x128xf32>,
    %c4_i32 = arith.constant 4 : i32
    %c8_i32_28 = arith.constant 8 : i32
    %48 = arith.muli %c4_i32, %c8_i32_28 : i32
    %49 = tpu.assume_multiple %48, 8 : i32
    %50 = arith.index_cast %49 : i32 to index
    %c0_29 = arith.constant 0 : index
    %51 = vector.load %arg10[%50, %c0_29] : memref<64x128xf32, #tpu.memory_space<vmem>>, vector<8x128xf32>
    %cst_30 = arith.constant dense<0.000000e+00> : vector<8x128xf32>
    %52 = tpu.matmul %45, %10, %cst_30 {dimension_numbers = #tpu.dot_dimension_numbers<[1], [0], [0], [1], [0, 0, 1, 1], [], []>} : vector<8x128xf32>, vector<128x128xf32>, vector<8x128xf32> -> vector<8x128xf32>
    %53 = arith.addf %51, %52 : vector<8x128xf32>
    %54 = math.tanh %53 : vector<8x128xf32>
    %55 = arith.index_cast %49 : i32 to index
    %c0_31 = arith.constant 0 : index
    %56 = vector.load %arg10[%55, %c0_31] : memref<64x128xf32, #tpu.memory_space<vmem>>, vector<8x128xf32>
    tpu.vector_store %arg10[%55, %c0_31], %54 {strides = array<i32>} : memref<64x128xf32, #tpu.memory_space<vmem>>, vector<8x128xf32>,
    %c5_i32 = arith.constant 5 : i32
    %c8_i32_32 = arith.constant 8 : i32
    %57 = arith.muli %c5_i32, %c8_i32_32 : i32
    %58 = tpu.assume_multiple %57, 8 : i32
    %59 = arith.index_cast %58 : i32 to index
    %c0_33 = arith.constant 0 : index
    %60 = vector.load %arg10[%59, %c0_33] : memref<64x128xf32, #tpu.memory_space<vmem>>, vector<8x128xf32>
    %cst_34 = arith.constant dense<0.000000e+00> : vector<8x128xf32>
    %61 = tpu.matmul %54, %10, %cst_34 {dimension_numbers = #tpu.dot_dimension_numbers<[1], [0], [0], [1], [0, 0, 1, 1], [], []>} : vector<8x128xf32>, vector<128x128xf32>, vector<8x128xf32> -> vector<8x128xf32>
    %62 = arith.addf %60, %61 : vector<8x128xf32>
    %63 = math.tanh %62 : vector<8x128xf32>
    %64 = arith.index_cast %58 : i32 to index
    %c0_35 = arith.constant 0 : index
    %65 = vector.load %arg10[%64, %c0_35] : memref<64x128xf32, #tpu.memory_space<vmem>>, vector<8x128xf32>
    tpu.vector_store %arg10[%64, %c0_35], %63 {strides = array<i32>} : memref<64x128xf32, #tpu.memory_space<vmem>>, vector<8x128xf32>,
    %c6_i32 = arith.constant 6 : i32
    %c8_i32_36 = arith.constant 8 : i32
    %66 = arith.muli %c6_i32, %c8_i32_36 : i32
    %67 = tpu.assume_multiple %66, 8 : i32
    %68 = arith.index_cast %67 : i32 to index
    %c0_37 = arith.constant 0 : index
    %69 = vector.load %arg10[%68, %c0_37] : memref<64x128xf32, #tpu.memory_space<vmem>>, vector<8x128xf32>
    %cst_38 = arith.constant dense<0.000000e+00> : vector<8x128xf32>
    %70 = tpu.matmul %63, %10, %cst_38 {dimension_numbers = #tpu.dot_dimension_numbers<[1], [0], [0], [1], [0, 0, 1, 1], [], []>} : vector<8x128xf32>, vector<128x128xf32>, vector<8x128xf32> -> vector<8x128xf32>
    %71 = arith.addf %69, %70 : vector<8x128xf32>
    %72 = math.tanh %71 : vector<8x128xf32>
    %73 = arith.index_cast %67 : i32 to index
    %c0_39 = arith.constant 0 : index
    %74 = vector.load %arg10[%73, %c0_39] : memref<64x128xf32, #tpu.memory_space<vmem>>, vector<8x128xf32>
    tpu.vector_store %arg10[%73, %c0_39], %72 {strides = array<i32>} : memref<64x128xf32, #tpu.memory_space<vmem>>, vector<8x128xf32>,
    %c7_i32 = arith.constant 7 : i32
    %c8_i32_40 = arith.constant 8 : i32
    %75 = arith.muli %c7_i32, %c8_i32_40 : i32
    %76 = tpu.assume_multiple %75, 8 : i32
    %77 = arith.index_cast %76 : i32 to index
    %c0_41 = arith.constant 0 : index
    %78 = vector.load %arg10[%77, %c0_41] : memref<64x128xf32, #tpu.memory_space<vmem>>, vector<8x128xf32>
    %cst_42 = arith.constant dense<0.000000e+00> : vector<8x128xf32>
    %79 = tpu.matmul %72, %10, %cst_42 {dimension_numbers = #tpu.dot_dimension_numbers<[1], [0], [0], [1], [0, 0, 1, 1], [], []>} : vector<8x128xf32>, vector<128x128xf32>, vector<8x128xf32> -> vector<8x128xf32>
    %80 = arith.addf %78, %79 : vector<8x128xf32>
    %81 = math.tanh %80 : vector<8x128xf32>
    %82 = arith.index_cast %76 : i32 to index
    %c0_43 = arith.constant 0 : index
    %83 = vector.load %arg10[%82, %c0_43] : memref<64x128xf32, #tpu.memory_space<vmem>>, vector<8x128xf32>
    tpu.vector_store %arg10[%82, %c0_43], %81 {strides = array<i32>} : memref<64x128xf32, #tpu.memory_space<vmem>>, vector<8x128xf32>,
    %c8_i32_44 = arith.constant 8 : i32
    %c0_45 = arith.constant 0 : index
    %c0_46 = arith.constant 0 : index
    %84 = vector.load %arg9[%c0_45, %c0_46] : memref<8x128xf32, #tpu.memory_space<vmem>>, vector<8x128xf32>
    tpu.vector_store %arg9[%c0_45, %c0_46], %81 {strides = array<i32>} : memref<8x128xf32, #tpu.memory_space<vmem>>, vector<8x128xf32>,
    %c0_47 = arith.constant 0 : index
    %c0_48 = arith.constant 0 : index
    %85 = vector.load %arg10[%c0_47, %c0_48] : memref<64x128xf32, #tpu.memory_space<vmem>>, vector<64x128xf32>
    %c0_49 = arith.constant 0 : index
    %c0_50 = arith.constant 0 : index
    %86 = vector.load %arg6[%c0_49, %c0_50] : memref<128x128xf32, #tpu.memory_space<vmem>>, vector<128x128xf32>
    %cst_51 = arith.constant dense<0.000000e+00> : vector<64x128xf32>
    %87 = tpu.matmul %85, %86, %cst_51 {dimension_numbers = #tpu.dot_dimension_numbers<[1], [0], [0], [1], [0, 0, 1, 1], [], []>} : vector<64x128xf32>, vector<128x128xf32>, vector<64x128xf32> -> vector<64x128xf32>
    %c0_52 = arith.constant 0 : index
    %c0_53 = arith.constant 0 : index
    %88 = vector.load %arg7[%c0_52, %c0_53] : memref<1x128xf32, #tpu.memory_space<vmem>>, vector<1x128xf32>
    %89 = vector.broadcast %88 : vector<1x128xf32> to vector<64x128xf32>
    %90 = arith.addf %87, %89 : vector<64x128xf32>
    %cst_54 = arith.constant dense<0xFF800000> : vector<64xf32>
    %91 = vector.multi_reduction <maximumf>, %90, %cst_54 [1] : vector<64x128xf32> to vector<64xf32>
    %92 = vector.shape_cast %91 : vector<64xf32> to vector<64x1xf32>
    %93 = vector.broadcast %92 : vector<64x1xf32> to vector<64x128xf32>
    %94 = arith.subf %90, %93 : vector<64x128xf32>
    %95 = math.exp %94 : vector<64x128xf32>
    %cst_55 = arith.constant dense<0.000000e+00> : vector<64xf32>
    %96 = vector.multi_reduction <add>, %95, %cst_55 [1] : vector<64x128xf32> to vector<64xf32>
    %97 = vector.shape_cast %96 : vector<64xf32> to vector<64x1xf32>
    %98 = math.log %97 : vector<64x1xf32>
    %99 = arith.addf %92, %98 : vector<64x1xf32>
    %100 = vector.broadcast %99 : vector<64x1xf32> to vector<64x128xf32>
    %101 = arith.subf %90, %100 : vector<64x128xf32>
    %c0_56 = arith.constant 0 : index
    %c0_57 = arith.constant 0 : index
    %102 = vector.load %arg8[%c0_56, %c0_57] : memref<64x128xf32, #tpu.memory_space<vmem>>, vector<64x128xf32>
    tpu.vector_store %arg8[%c0_56, %c0_57], %101 {strides = array<i32>} : memref<64x128xf32, #tpu.memory_space<vmem>>, vector<64x128xf32>,
    return
  }
  func.func @transform_0(%arg0: i32) -> (i32, i32) {
    %c0_i32 = arith.constant 0 : i32
    %c0_i32_0 = arith.constant 0 : i32
    return %arg0, %c0_i32 : i32, i32
  }
  func.func @transform_1(%arg0: i32) -> (i32, i32) {
    %c0_i32 = arith.constant 0 : i32
    %c0_i32_0 = arith.constant 0 : i32
    %c0_i32_1 = arith.constant 0 : i32
    return %c0_i32, %c0_i32_0 : i32, i32
  }
  func.func @transform_2(%arg0: i32) -> (i32, i32) {
    %c0_i32 = arith.constant 0 : i32
    %c0_i32_0 = arith.constant 0 : i32
    %c0_i32_1 = arith.constant 0 : i32
    return %c0_i32, %c0_i32_0 : i32, i32
  }
  func.func @transform_3(%arg0: i32) -> (i32, i32) {
    %c0_i32 = arith.constant 0 : i32
    %c0_i32_0 = arith.constant 0 : i32
    %c0_i32_1 = arith.constant 0 : i32
    return %c0_i32, %c0_i32_0 : i32, i32
  }
  func.func @transform_4(%arg0: i32) -> (i32, i32) {
    %c0_i32 = arith.constant 0 : i32
    %c0_i32_0 = arith.constant 0 : i32
    %c0_i32_1 = arith.constant 0 : i32
    return %c0_i32, %c0_i32_0 : i32, i32
  }
  func.func @transform_5(%arg0: i32) -> (i32, i32) {
    %c0_i32 = arith.constant 0 : i32
    %c0_i32_0 = arith.constant 0 : i32
    %c0_i32_1 = arith.constant 0 : i32
    return %c0_i32, %c0_i32_0 : i32, i32
  }
  func.func @transform_6(%arg0: i32) -> (i32, i32) {
    %c0_i32 = arith.constant 0 : i32
    %c0_i32_0 = arith.constant 0 : i32
    %c0_i32_1 = arith.constant 0 : i32
    return %c0_i32, %c0_i32_0 : i32, i32
  }
  func.func @transform_7(%arg0: i32) -> (i32, i32) {
    %c0_i32 = arith.constant 0 : i32
    %c0_i32_0 = arith.constant 0 : i32
    return %arg0, %c0_i32 : i32, i32
  }
}

</mosaic_0001>

<bundles_post_ra>
// kernel: tpu_custom_call.1
= control target key start
LH: loop header
LB: loop body
LE: loop exit
PB: predicated region body
PF: predicated region fallthrough
CT: control target
= control target key end

     0   :  { %12 = vsyncpa [#allocation5], 0  ;;  %s2250_s0 = inlined_call_operand.vmem [shape: f32[64,16], index: 0, kind: input, shape index: {}]   ;;  %s2251_s1 = inlined_call_operand.vmem [shape: f32[8,128], index: 1, kind: input, shape index: {}]   ;;  %s2252_s2 = inlined_call_operand.vmem [shape: f32[16,128], index: 2, kind: input, shape index: {}]   ;;  %s2253_s3 = inlined_call_operand.hbm [shape: f32[128,128], index: 3, kind: input, shape index: {}]   ;;  %s2254_s4 = inlined_call_operand.vmem [shape: f32[1,128], index: 4, kind: input, shape index: {}]   ;;  %s2255_s5 = inlined_call_operand.hbm [shape: f32[128,128], index: 5, kind: input, shape index: {}]   ;;  %s2256_s6 = inlined_call_operand.vmem [shape: f32[1,128], index: 6, kind: input, shape index: {}]   ;;  %s2257_s7 = inlined_call_operand.hbm [shape: f32[64,128], index: 7, kind: output, shape index: {}]  }
   0x1   :  { %13 = vsyncpa [#allocation8], 0 }
   0x2   :  { %14 = vsyncpa [#allocation6], 0  ;;  %s1724_s24 = smov [#allocation4]  }
   0x3   :  { %s26_s25 = sshll.u32 %s1724_s24, 4  ;;  %s27_s25 = int_to_ptr.vmem [resolvable:$true] %s26_s25 }
   0x4   :  { %s1666_s26 = scalar_lea.vmem %s27_s25, 2048  ;;  %p1671_p1 = scmp.lt.s32.totalorder %s27_s25, %s27_s25 }
   0x5   :  { %p1667_p0 = scmp.ne.s32.totalorder %s27_s25, %s1666_s26  ;;  %p1672_p2 = scmp.lt.s32.totalorder %s1666_s26, %s1666_s26 }
   0x7   :  { %p1673_p3 = por %p1672_p2, %p1671_p1 }
   0x9   :  { %p1674_p4 = pnand %p1673_p3, %p1667_p0 }
   0xb   :  { %1677 = shalt.err (!%p1674_p4)
}
   0xc   :  { %s1725_s27 = smov 128   ;;  %s1726_s28 = smov 8  }
   0xd   :  { %32 = dma.hbm_to_vmem [thread:$0]  %s2253_s3, 2048, %s27_s25, [#allocation5], %s1725_s27, %s1725_s27, %s1726_s28  }
   0xe   :  { %s1727_s8 = smov [#allocation7]  }
   0xf   :  { %s40_s9 = sshll.u32 %s1727_s8, 4  ;;  %s41_s9 = int_to_ptr.vmem [resolvable:$true] %s40_s9 }
  0x10   :  { %s1686_s10 = scalar_lea.vmem %s41_s9, 2048  ;;  %p1691_p6 = scmp.lt.s32.totalorder %s41_s9, %s41_s9 }
  0x11   :  { %p1687_p5 = scmp.ne.s32.totalorder %s41_s9, %s1686_s10  ;;  %p1692_p7 = scmp.lt.s32.totalorder %s1686_s10, %s1686_s10 }
  0x13   :  { %p1693_p8 = por %p1692_p7, %p1691_p6 }
  0x15   :  { %p1694_p9 = pnand %p1693_p8, %p1687_p5 }
  0x17   :  { %1697 = shalt.err (!%p1694_p9)
}
  0x18   :  { %46 = dma.hbm_to_vmem [thread:$0]  %s2255_s5, 2048, %s41_s9, [#allocation8], %s1725_s27, %s1725_s27, %s1726_s28  }
  0x19   :  { %1718 = dma.done.wait [#allocation5], 2048  }
  0x1a   :  { %1719 = vsyncadd [#allocation5], 4294965248 }
  0x1b   :  { %1720 = dma.done.wait [#allocation8], 2048  }
  0x1c   :  { %1721 = vsyncadd [#allocation8], 4294965248  ;;  %v1728_v0 = vmov 0.0   ;;  %vm1729_vm0 = vmmov 0   ;;  %v1786_v1 = vld [vmem:[#allocation4 + $0x78] sm:$0xff]  ;;  %v1788_v2 = vld [vmem:[#allocation4 + $0x70] sm:$0xff] }
  0x1d   :  { %1279 = vmatprep.subr.mxu0 %v1728_v0  ;;  %1311 = vmatprep.mubr.msk.f32.mxu0 %vm1729_vm0, %v1728_v0  ;;  %v1792_v3 = vld [vmem:[#allocation4 + $0x68] sm:$0xff]  ;;  %v1799_v5 = vld [vmem:[#allocation4 + $0x60] sm:$0xff]  ;;  %vm78_vm1 = vcmask 130048   ;;  %v1809_v8 = vld [vmem:[#allocation4 + $0x58] sm:$0xff] }
  0x1e   :  { %1280 = vmatpush3.msra.mxu0 %v1786_v1  ;;  %v70_v4 = vld [vmem:[%s2252_s2 + $0x8] sm:$0xff]  ;;  %v69_v6 = vld [vmem:[%s2252_s2] sm:$0xff]  ;;  %v1816_v10 = vld [vmem:[#allocation4 + $0x50] sm:$0xff] }
  0x1f   :  { %1281 = vmatprep.subr.mxu0 %v1728_v0  ;;  %1263 = vmatprep.subr.mxu1 %v70_v4  ;;  %v61_v7 = vld [vmem:[%s2250_s0] sm:$0xff]  ;;  %v62_v9 = vld [vmem:[%s2250_s0 + $0x8] sm:$0xff]  ;;  %v1834_v13 = vld [vmem:[#allocation4 + $0x38] sm:$0xff] }
  0x20   :  { %1282 = vmatpush3.msra.mxu0 %v1788_v2  ;;  %1264 = vmatpush3.msra.mxu1 %v70_v4  ;;  %v1822_v11 = vld [vmem:[#allocation4 + $0x48] sm:$0xff]  ;;  %v1828_v12 = vld [vmem:[#allocation4 + $0x40] sm:$0xff]  ;;  %v1840_v14 = vld [vmem:[#allocation4 + $0x30] sm:$0xff] }
  0x21   :  { %1283 = vmatprep.subr.mxu0 %v1728_v0  ;;  %1265 = vmatprep.subr.mxu1 %v69_v6  ;;  %v1846_v15 = vld [vmem:[#allocation4 + $0x28] sm:$0xff]  ;;  %v1852_v16 = vld [vmem:[#allocation4 + $0x20] sm:$0xff]  ;;  %v1858_v17 = vld [vmem:[#allocation4 + $0x18] sm:$0xff] }
  0x22   :  { %1284 = vmatpush3.msra.mxu0 %v1792_v3  ;;  %1266 = vmatpush3.msra.mxu1 %v69_v6  ;;  %v1864_v18 = vld [vmem:[#allocation4 + $0x10] sm:$0xff]  ;;  %v1870_v19 = vld [vmem:[#allocation4 + $0x8] sm:$0xff]  ;;  %v1876_v20 = vld [vmem:[#allocation4] sm:$0xff] }
  0x23   :  { %1285 = vmatprep.subr.mxu0 %v1728_v0  ;;  %1267 = vmatprep.mubr.msk.f32.mxu1 %vm78_vm1, %v61_v7  ;;  %v59_v21 = vld [vmem:[%s2251_s1] sm:$0xff]  ;;  %v63_v30 = vld [vmem:[%s2250_s0 + $0x10] sm:$0xff]  ;;  %v64_v31 = vld [vmem:[%s2250_s0 + $0x18] sm:$0xff] }
  0x24   :  { %1286 = vmatpush3.msra.mxu0 %v1799_v5  ;;  %1268 = vmatmul.mubr.msk.f32.vlgmr.msra.gmra.mxu1 %vm78_vm1, %v62_v9  ;;  %v1937_v23 = vld [vmem:[%s2254_s4] ss:$0 sm:$0xff]  ;;  %v66_v33 = vld [vmem:[%s2250_s0 + $0x28] sm:$0xff]  ;;  %v67_v34 = vld [vmem:[%s2250_s0 + $0x30] sm:$0xff] }
  0x25   :  { %1287 = vmatprep.subr.mxu0 %v1728_v0  ;;  %1349 = vmatprep.subr.mxu1 %v1728_v0  ;;  %v65_v32 = vld [vmem:[%s2250_s0 + $0x20] sm:$0xff]  ;;  %v68_v35 = vld [vmem:[%s2250_s0 + $0x38] sm:$0xff]  ;;  %v854_v6 = vld [vmem:[#allocation7 + $0x68] sm:$0xff] }
  0x26   :  { %1288 = vmatpush3.msra.mxu0 %v1809_v8  ;;  %1350 = vmatpush3.msra.mxu1 %v1786_v1  ;;  %v856_v62 = vld [vmem:[#allocation7 + $0x78] sm:$0xff]  ;;  %v850_v9 = vld [vmem:[#allocation7 + $0x48] sm:$0xff] }
  0x27   :  { %1289 = vmatprep.subr.mxu0 %v1728_v0  ;;  %1351 = vmatprep.subr.mxu1 %v1728_v0  ;;  %v852_v7 = vld [vmem:[#allocation7 + $0x58] sm:$0xff] }
  0x28   :  { %1290 = vmatpush3.msra.mxu0 %v1816_v10  ;;  %1352 = vmatpush3.msra.mxu1 %v1788_v2 }
  0x29   :  { %1291 = vmatprep.subr.mxu0 %v1728_v0  ;;  %1353 = vmatprep.subr.mxu1 %v1728_v0 }
  0x2a   :  { %1292 = vmatpush3.msra.mxu0 %v1822_v11  ;;  %1354 = vmatpush3.msra.mxu1 %v1792_v3 }
  0x2b   :  { %1293 = vmatprep.subr.mxu0 %v1728_v0  ;;  %1355 = vmatprep.subr.mxu1 %v1728_v0 }
  0x2c   :  { %1294 = vmatpush3.msra.mxu0 %v1828_v12  ;;  %1356 = vmatpush3.msra.mxu1 %v1799_v5 }
  0x2d   :  { %1295 = vmatprep.subr.mxu0 %v1728_v0  ;;  %1357 = vmatprep.subr.mxu1 %v1728_v0 }
  0x2e   :  { %1296 = vmatpush3.msra.mxu0 %v1834_v13  ;;  %1358 = vmatpush3.msra.mxu1 %v1809_v8 }
  0x2f   :  { %1297 = vmatprep.subr.mxu0 %v1728_v0  ;;  %1359 = vmatprep.subr.mxu1 %v1728_v0 }
  0x30   :  { %1298 = vmatpush3.msra.mxu0 %v1840_v14  ;;  %1360 = vmatpush3.msra.mxu1 %v1816_v10 }
  0x31   :  { %1299 = vmatprep.subr.mxu0 %v1728_v0  ;;  %1361 = vmatprep.subr.mxu1 %v1728_v0 }
  0x32   :  { %1300 = vmatpush3.msra.mxu0 %v1846_v15  ;;  %1362 = vmatpush3.msra.mxu1 %v1822_v11 }
  0x33   :  { %1301 = vmatprep.subr.mxu0 %v1728_v0  ;;  %1363 = vmatprep.subr.mxu1 %v1728_v0 }
  0x34   :  { %1302 = vmatpush3.msra.mxu0 %v1852_v16  ;;  %1364 = vmatpush3.msra.mxu1 %v1828_v12 }
  0x35   :  { %1303 = vmatprep.subr.mxu0 %v1728_v0  ;;  %1365 = vmatprep.subr.mxu1 %v1728_v0 }
  0x36   :  { %1304 = vmatpush3.msra.mxu0 %v1858_v17  ;;  %1366 = vmatpush3.msra.mxu1 %v1834_v13 }
  0x37   :  { %1305 = vmatprep.subr.mxu0 %v1728_v0  ;;  %1367 = vmatprep.subr.mxu1 %v1728_v0 }
  0x38   :  { %1306 = vmatpush3.msra.mxu0 %v1864_v18  ;;  %1368 = vmatpush3.msra.mxu1 %v1840_v14 }
  0x39   :  { %1307 = vmatprep.subr.mxu0 %v1728_v0  ;;  %1369 = vmatprep.subr.mxu1 %v1728_v0 }
  0x3a   :  { %1308 = vmatpush3.msra.mxu0 %v1870_v19  ;;  %1370 = vmatpush3.msra.mxu1 %v1846_v15 }
  0x3b   :  { %1309 = vmatprep.subr.mxu0 %v1728_v0  ;;  %1371 = vmatprep.subr.mxu1 %v1728_v0 }
  0x3c   :  { %1310 = vmatpush3.msra.mxu0 %v1876_v20  ;;  %1372 = vmatpush3.msra.mxu1 %v1852_v16 }
  0x3d   :  { %1312 = vmatmul.mubr.f32.vlgmr.msra.gmra.mxu0 %v59_v21  ;;  %1314 = vmatprep.subr.mxu0 %v1728_v0 }
  0x3e   :  { %1315 = vmatpush3.msra.mxu0 %v1786_v1  ;;  %1346 = vmatprep.mubr.msk.f32.mxu0 %vm1729_vm0, %v1728_v0 }
  0x3f   :  { %1316 = vmatprep.subr.mxu0 %v1728_v0  ;;  %1373 = vmatprep.subr.mxu1 %v1728_v0 }
  0x40   :  { %1317 = vmatpush3.msra.mxu0 %v1788_v2  ;;  %1374 = vmatpush3.msra.mxu1 %v1858_v17 }
  0x41   :  { %1318 = vmatprep.subr.mxu0 %v1728_v0  ;;  %1375 = vmatprep.subr.mxu1 %v1728_v0 }
  0x42   :  { %1319 = vmatpush3.msra.mxu0 %v1792_v3  ;;  %1376 = vmatpush3.msra.mxu1 %v1864_v18 }
  0x43   :  { %1320 = vmatprep.subr.mxu0 %v1728_v0  ;;  %1377 = vmatprep.subr.mxu1 %v1728_v0 }
  0x44   :  { %1321 = vmatpush3.msra.mxu0 %v1799_v5  ;;  %1378 = vmatpush3.msra.mxu1 %v1870_v19 }
  0x45   :  { %1322 = vmatprep.subr.mxu0 %v1728_v0  ;;  %1379 = vmatprep.subr.mxu1 %v1728_v0 }
  0x46   :  { %1323 = vmatpush3.msra.mxu0 %v1809_v8  ;;  %1380 = vmatpush3.msra.mxu1 %v1876_v20 }
  0x47   :  { %1324 = vmatprep.subr.mxu0 %v1728_v0  ;;  %1419 = vmatprep.subr.mxu1 %v1728_v0 }
  0x48   :  { %1325 = vmatpush3.msra.mxu0 %v1816_v10  ;;  %1270 = vmatprep.mubr.msk.f32.mxu1 %vm78_vm1, %v63_v30 }
  0x49   :  { %1326 = vmatprep.subr.mxu0 %v1728_v0  ;;  %1271 = vmatmul.mubr.msk.f32.gmra.mxu1 %vm78_vm1, %v64_v31 }
  0x4a   :  { %1327 = vmatpush3.msra.mxu0 %v1822_v11  ;;  %1273 = vmatprep.mubr.msk.f32.mxu1 %vm78_vm1, %v65_v32 }
  0x4b   :  { %1328 = vmatprep.subr.mxu0 %v1728_v0 }
  0x4c   :  { %1329 = vmatpush3.msra.mxu0 %v1828_v12 }
  0x4d   :  { %1330 = vmatprep.subr.mxu0 %v1728_v0  ;;  %1274 = vmatmul.mubr.msk.f32.gmra.mxu1 %vm78_vm1, %v66_v33 }
  0x4e   :  { %1331 = vmatpush3.msra.mxu0 %v1834_v13  ;;  %1276 = vmatprep.mubr.msk.f32.mxu1 %vm78_vm1, %v67_v34 }
  0x4f   :  { %1332 = vmatprep.subr.mxu0 %v1728_v0 }
  0x50   :  { %1333 = vmatpush3.msra.mxu0 %v1840_v14 }
  0x51   :  { %1334 = vmatprep.subr.mxu0 %v1728_v0  ;;  %1277 = vmatmul.mubr.msk.f32.gmra.mxu1 %vm78_vm1, %v68_v35 }
  0x52   :  { %1335 = vmatpush3.msra.mxu0 %v1846_v15  ;;  %1381 = vmatprep.mubr.msk.f32.mxu1 %vm1729_vm0, %v1728_v0 }
  0x53   :  { %1336 = vmatprep.subr.mxu0 %v1728_v0 }
  0x54   :  { %1337 = vmatpush3.msra.mxu0 %v1852_v16 }
  0x55   :  { %1338 = vmatprep.subr.mxu0 %v1728_v0 }
  0x56   :  { %1339 = vmatpush3.msra.mxu0 %v1858_v17 }
  0x57   :  { %1340 = vmatprep.subr.mxu0 %v1728_v0 }
  0x58   :  { %1341 = vmatpush3.msra.mxu0 %v1864_v18 }
  0x59   :  { %1342 = vmatprep.subr.mxu0 %v1728_v0 }
  0x5a   :  { %1343 = vmatpush3.msra.mxu0 %v1870_v19 }
  0x5b   :  { %1344 = vmatprep.subr.mxu0 %v1728_v0 }
  0x5c   :  { %1345 = vmatpush3.msra.mxu0 %v1876_v20 }
  0x5d   :  { %1384 = vmatprep.subr.mxu0 %v1728_v0 }
  0xe4   :  { %v1269_v22 = vpop.f32.mrf.mxu1 }
  0xe5   :  { %v175_v36 = vadd.f32 %v1269_v22, %v1937_v23 }
  0xe6   :  { %v169_v24 = vpop.f32.mrf.mxu1 }
  0xe7   :  { %v170_v25 = vadd.f32 %v1937_v23, %v169_v24 }
  0xfd   :  { %v300_v26 = vpop.f32.mrf.mxu0 }
  0xfe   :  { %v304_v27 = vadd.f32 %v300_v26, %v170_v25  ;;  %v1092_v25 = vld [vmem:[%s2256_s6] ss:$0 sm:$0xff]  ;;  %s1730_s6 = smov [#allocation9]  }
  0xff   :  { %v1313_v28 = vpop.f32.mrf.mxu0  ;;  %s1070_s12 = sshll.u32 %s1730_s6, 4  ;;  %s1071_s12 = int_to_ptr.vmem [resolvable:$true] %s1070_s12 }
 0x100   :  { %1610 = vtanh.f32 %v304_v27  ;;  %s1698_s3 = scalar_lea.vmem %s1071_s12, 1024  ;;  %p1703_p11 = scmp.lt.s32.totalorder %s1071_s12, %s1071_s12 }
 0x101   :  { %p1699_p10 = scmp.ne.s32.totalorder %s1071_s12, %s1698_s3  ;;  %p1704_p12 = scmp.lt.s32.totalorder %s1698_s3, %s1698_s3 }
 0x103   :  { %p1705_p13 = por %p1704_p12, %p1703_p11 }
 0x105   :  { %p1706_p0 = pnand %p1705_p13, %p1699_p10 }
 0x109   :  { %v1272_v41 = vpop.f32.mrf.mxu1 }
 0x10a   :  { %v185_v52 = vadd.f32 %v1272_v41, %v1937_v23 }
 0x10b   :  { %v179_v42 = vpop.f32.mrf.mxu1 }
 0x10c   :  { %v180_v47 = vadd.f32 %v1937_v23, %v179_v42 }
 0x10d   :  { %v1940_v29 = vpop.eup %1610  ;;  %v2041_v43 = vpop.f32.mrf.mxu1 }
 0x10e   :  { %1347 = vmatmul.mubr.f32.vlgmr.msra.gmra.mxu0 %v1940_v29  ;;  %v195_v63 = vadd.f32 %v2041_v43, %v1937_v23 }
 0x10f   :  { %1385 = vmatpush3.msra.mxu0 %v1786_v1  ;;  %1416 = vmatprep.mubr.msk.f32.mxu0 %vm1729_vm0, %v1728_v0  ;;  %v2043_v44 = vpop.f32.mrf.mxu1 }
 0x110   :  { %1386 = vmatprep.subr.mxu0 %v1728_v0  ;;  %v190_v57 = vadd.f32 %v1937_v23, %v2043_v44 }
 0x111   :  { %1387 = vmatpush3.msra.mxu0 %v1788_v2  ;;  %v2045_v45 = vpop.f32.mrf.mxu1 }
 0x112   :  { %1388 = vmatprep.subr.mxu0 %v1728_v0 }
 0x113   :  { %1389 = vmatpush3.msra.mxu0 %v1792_v3  ;;  %v2047_v46 = vpop.f32.mrf.mxu1 }
 0x114   :  { %1390 = vmatprep.subr.mxu0 %v1728_v0 }
 0x115   :  { %1391 = vmatpush3.msra.mxu0 %v1799_v5 }
 0x116   :  { %1392 = vmatprep.subr.mxu0 %v1728_v0 }
 0x117   :  { %1393 = vmatpush3.msra.mxu0 %v1809_v8 }
 0x118   :  { %1394 = vmatprep.subr.mxu0 %v1728_v0 }
 0x119   :  { %1395 = vmatpush3.msra.mxu0 %v1816_v10 }
 0x11a   :  { %1396 = vmatprep.subr.mxu0 %v1728_v0 }
 0x11b   :  { %1397 = vmatpush3.msra.mxu0 %v1822_v11 }
 0x11c   :  { %1398 = vmatprep.subr.mxu0 %v1728_v0 }
 0x11d   :  { %1399 = vmatpush3.msra.mxu0 %v1828_v12 }
 0x11e   :  { %1400 = vmatprep.subr.mxu0 %v1728_v0 }
 0x11f   :  { %1401 = vmatpush3.msra.mxu0 %v1834_v13 }
 0x120   :  { %1402 = vmatprep.subr.mxu0 %v1728_v0 }
 0x121   :  { %1403 = vmatpush3.msra.mxu0 %v1840_v14 }
 0x122   :  { %1404 = vmatprep.subr.mxu0 %v1728_v0 }
 0x123   :  { %1405 = vmatpush3.msra.mxu0 %v1846_v15 }
 0x124   :  { %1406 = vmatprep.subr.mxu0 %v1728_v0 }
 0x125   :  { %1407 = vmatpush3.msra.mxu0 %v1852_v16 }
 0x126   :  { %1408 = vmatprep.subr.mxu0 %v1728_v0 }
 0x127   :  { %1409 = vmatpush3.msra.mxu0 %v1858_v17 }
 0x128   :  { %1410 = vmatprep.subr.mxu0 %v1728_v0 }
 0x129   :  { %1411 = vmatpush3.msra.mxu0 %v1864_v18 }
 0x12a   :  { %1412 = vmatprep.subr.mxu0 %v1728_v0 }
 0x12b   :  { %1413 = vmatpush3.msra.mxu0 %v1870_v19 }
 0x12c   :  { %1414 = vmatprep.subr.mxu0 %v1728_v0 }
 0x12d   :  { %1415 = vmatpush3.msra.mxu0 %v1876_v20 }
 0x12e   :  { %1454 = vmatprep.subr.mxu0 %v1728_v0 }
 0x1ce   :  { %v375_v37 = vpop.f32.mrf.mxu0 }
 0x1cf   :  { %v379_v38 = vadd.f32 %v375_v37, %v175_v36 }
 0x1d0   :  { %v1348_v39 = vpop.f32.mrf.mxu0 }
 0x1d1   :  { %1612 = vtanh.f32 %v379_v38  ;;  %v205_v38 = vadd.f32 %v2045_v45, %v1937_v23 }
 0x1de   :  { %v2004_v40 = vpop.eup %1612 }
 0x1df   :  { %1382 = vmatmul.mubr.f32.vlgmr.msra.gmra.mxu1 %v2004_v40 }
 0x1e0   :  { %1420 = vmatpush3.msra.mxu1 %v1786_v1  ;;  %1451 = vmatprep.mubr.msk.f32.mxu1 %vm1729_vm0, %v1728_v0 }
 0x1e1   :  { %1421 = vmatprep.subr.mxu1 %v1728_v0 }
 0x1e2   :  { %1422 = vmatpush3.msra.mxu1 %v1788_v2 }
 0x1e3   :  { %1423 = vmatprep.subr.mxu1 %v1728_v0 }
 0x1e4   :  { %1424 = vmatpush3.msra.mxu1 %v1792_v3 }
 0x1e5   :  { %1425 = vmatprep.subr.mxu1 %v1728_v0 }
 0x1e6   :  { %1426 = vmatpush3.msra.mxu1 %v1799_v5 }
 0x1e7   :  { %1427 = vmatprep.subr.mxu1 %v1728_v0 }
 0x1e8   :  { %1428 = vmatpush3.msra.mxu1 %v1809_v8 }
 0x1e9   :  { %1429 = vmatprep.subr.mxu1 %v1728_v0 }
 0x1ea   :  { %1430 = vmatpush3.msra.mxu1 %v1816_v10 }
 0x1eb   :  { %1431 = vmatprep.subr.mxu1 %v1728_v0 }
 0x1ec   :  { %1432 = vmatpush3.msra.mxu1 %v1822_v11 }
 0x1ed   :  { %1433 = vmatprep.subr.mxu1 %v1728_v0 }
 0x1ee   :  { %1434 = vmatpush3.msra.mxu1 %v1828_v12 }
 0x1ef   :  { %1435 = vmatprep.subr.mxu1 %v1728_v0 }
 0x1f0   :  { %1436 = vmatpush3.msra.mxu1 %v1834_v13 }
 0x1f1   :  { %1437 = vmatprep.subr.mxu1 %v1728_v0 }
 0x1f2   :  { %1438 = vmatpush3.msra.mxu1 %v1840_v14 }
 0x1f3   :  { %1439 = vmatprep.subr.mxu1 %v1728_v0 }
 0x1f4   :  { %1440 = vmatpush3.msra.mxu1 %v1846_v15 }
 0x1f5   :  { %1441 = vmatprep.subr.mxu1 %v1728_v0 }
 0x1f6   :  { %1442 = vmatpush3.msra.mxu1 %v1852_v16 }
 0x1f7   :  { %1443 = vmatprep.subr.mxu1 %v1728_v0 }
 0x1f8   :  { %1444 = vmatpush3.msra.mxu1 %v1858_v17 }
 0x1f9   :  { %1445 = vmatprep.subr.mxu1 %v1728_v0 }
 0x1fa   :  { %1446 = vmatpush3.msra.mxu1 %v1864_v18 }
 0x1fb   :  { %1447 = vmatprep.subr.mxu1 %v1728_v0 }
 0x1fc   :  { %1448 = vmatpush3.msra.mxu1 %v1870_v19 }
 0x1fd   :  { %1449 = vmatprep.subr.mxu1 %v1728_v0 }
 0x1fe   :  { %1450 = vmatpush3.msra.mxu1 %v1876_v20 }
 0x1ff   :  { %1489 = vmatprep.subr.mxu1 %v1728_v0 }
 0x29f   :  { %v450_v48 = vpop.f32.mrf.mxu1 }
 0x2a0   :  { %v454_v49 = vadd.f32 %v450_v48, %v180_v47 }
 0x2a1   :  { %v1383_v50 = vpop.f32.mrf.mxu1 }
 0x2a2   :  { %1614 = vtanh.f32 %v454_v49 }
 0x2af   :  { %v2050_v51 = vpop.eup %1614 }
 0x2b0   :  { %1417 = vmatmul.mubr.f32.vlgmr.msra.gmra.mxu0 %v2050_v51 }
 0x2b1   :  { %1455 = vmatpush3.msra.mxu0 %v1786_v1  ;;  %1486 = vmatprep.mubr.msk.f32.mxu0 %vm1729_vm0, %v1728_v0 }
 0x2b2   :  { %1456 = vmatprep.subr.mxu0 %v1728_v0 }
 0x2b3   :  { %1457 = vmatpush3.msra.mxu0 %v1788_v2 }
 0x2b4   :  { %1458 = vmatprep.subr.mxu0 %v1728_v0 }
 0x2b5   :  { %1459 = vmatpush3.msra.mxu0 %v1792_v3 }
 0x2b6   :  { %1460 = vmatprep.subr.mxu0 %v1728_v0 }
 0x2b7   :  { %1461 = vmatpush3.msra.mxu0 %v1799_v5 }
 0x2b8   :  { %1462 = vmatprep.subr.mxu0 %v1728_v0 }
 0x2b9   :  { %1463 = vmatpush3.msra.mxu0 %v1809_v8 }
 0x2ba   :  { %1464 = vmatprep.subr.mxu0 %v1728_v0 }
 0x2bb   :  { %1465 = vmatpush3.msra.mxu0 %v1816_v10 }
 0x2bc   :  { %1466 = vmatprep.subr.mxu0 %v1728_v0 }
 0x2bd   :  { %1467 = vmatpush3.msra.mxu0 %v1822_v11 }
 0x2be   :  { %1468 = vmatprep.subr.mxu0 %v1728_v0 }
 0x2bf   :  { %1469 = vmatpush3.msra.mxu0 %v1828_v12 }
 0x2c0   :  { %1470 = vmatprep.subr.mxu0 %v1728_v0 }
 0x2c1   :  { %1471 = vmatpush3.msra.mxu0 %v1834_v13 }
 0x2c2   :  { %1472 = vmatprep.subr.mxu0 %v1728_v0 }
 0x2c3   :  { %1473 = vmatpush3.msra.mxu0 %v1840_v14 }
 0x2c4   :  { %1474 = vmatprep.subr.mxu0 %v1728_v0 }
 0x2c5   :  { %1475 = vmatpush3.msra.mxu0 %v1846_v15 }
 0x2c6   :  { %1476 = vmatprep.subr.mxu0 %v1728_v0 }
 0x2c7   :  { %1477 = vmatpush3.msra.mxu0 %v1852_v16 }
 0x2c8   :  { %1478 = vmatprep.subr.mxu0 %v1728_v0 }
 0x2c9   :  { %1479 = vmatpush3.msra.mxu0 %v1858_v17 }
 0x2ca   :  { %1480 = vmatprep.subr.mxu0 %v1728_v0 }
 0x2cb   :  { %1481 = vmatpush3.msra.mxu0 %v1864_v18 }
 0x2cc   :  { %1482 = vmatprep.subr.mxu0 %v1728_v0 }
 0x2cd   :  { %1483 = vmatpush3.msra.mxu0 %v1870_v19 }
 0x2ce   :  { %1484 = vmatprep.subr.mxu0 %v1728_v0 }
 0x2cf   :  { %1485 = vmatpush3.msra.mxu0 %v1876_v20 }
 0x2d0   :  { %1524 = vmatprep.subr.mxu0 %v1728_v0 }
 0x370   :  { %v525_v53 = vpop.f32.mrf.mxu0 }
 0x371   :  { %v529_v54 = vadd.f32 %v525_v53, %v185_v52 }
 0x372   :  { %v1418_v55 = vpop.f32.mrf.mxu0 }
 0x373   :  { %1616 = vtanh.f32 %v529_v54 }
 0x380   :  { %v2088_v56 = vpop.eup %1616 }
 0x381   :  { %1452 = vmatmul.mubr.f32.vlgmr.msra.gmra.mxu1 %v2088_v56 }
 0x382   :  { %1490 = vmatpush3.msra.mxu1 %v1786_v1  ;;  %1521 = vmatprep.mubr.msk.f32.mxu1 %vm1729_vm0, %v1728_v0 }
 0x383   :  { %1491 = vmatprep.subr.mxu1 %v1728_v0 }
 0x384   :  { %1492 = vmatpush3.msra.mxu1 %v1788_v2 }
 0x385   :  { %1493 = vmatprep.subr.mxu1 %v1728_v0 }
 0x386   :  { %1494 = vmatpush3.msra.mxu1 %v1792_v3 }
 0x387   :  { %1495 = vmatprep.subr.mxu1 %v1728_v0 }
 0x388   :  { %1496 = vmatpush3.msra.mxu1 %v1799_v5 }
 0x389   :  { %1497 = vmatprep.subr.mxu1 %v1728_v0 }
 0x38a   :  { %1498 = vmatpush3.msra.mxu1 %v1809_v8 }
 0x38b   :  { %1499 = vmatprep.subr.mxu1 %v1728_v0 }
 0x38c   :  { %1500 = vmatpush3.msra.mxu1 %v1816_v10 }
 0x38d   :  { %1501 = vmatprep.subr.mxu1 %v1728_v0 }
 0x38e   :  { %1502 = vmatpush3.msra.mxu1 %v1822_v11 }
 0x38f   :  { %1503 = vmatprep.subr.mxu1 %v1728_v0 }
 0x390   :  { %1504 = vmatpush3.msra.mxu1 %v1828_v12 }
 0x391   :  { %1505 = vmatprep.subr.mxu1 %v1728_v0 }
 0x392   :  { %1506 = vmatpush3.msra.mxu1 %v1834_v13 }
 0x393   :  { %1507 = vmatprep.subr.mxu1 %v1728_v0 }
 0x394   :  { %1508 = vmatpush3.msra.mxu1 %v1840_v14 }
 0x395   :  { %1509 = vmatprep.subr.mxu1 %v1728_v0 }
 0x396   :  { %1510 = vmatpush3.msra.mxu1 %v1846_v15 }
 0x397   :  { %1511 = vmatprep.subr.mxu1 %v1728_v0 }
 0x398   :  { %1512 = vmatpush3.msra.mxu1 %v1852_v16 }
 0x399   :  { %1513 = vmatprep.subr.mxu1 %v1728_v0 }
 0x39a   :  { %1514 = vmatpush3.msra.mxu1 %v1858_v17 }
 0x39b   :  { %1515 = vmatprep.subr.mxu1 %v1728_v0 }
 0x39c   :  { %1516 = vmatpush3.msra.mxu1 %v1864_v18 }
 0x39d   :  { %1517 = vmatprep.subr.mxu1 %v1728_v0 }
 0x39e   :  { %1518 = vmatpush3.msra.mxu1 %v1870_v19 }
 0x39f   :  { %1519 = vmatprep.subr.mxu1 %v1728_v0 }
 0x3a0   :  { %1520 = vmatpush3.msra.mxu1 %v1876_v20 }
 0x3a1   :  { %1559 = vmatprep.subr.mxu1 %v856_v62 }
 0x441   :  { %v600_v58 = vpop.f32.mrf.mxu1 }
 0x442   :  { %v604_v59 = vadd.f32 %v600_v58, %v190_v57 }
 0x443   :  { %v1453_v60 = vpop.f32.mrf.mxu1 }
 0x444   :  { %1618 = vtanh.f32 %v604_v59 }
 0x451   :  { %v2126_v61 = vpop.eup %1618 }
 0x452   :  { %1487 = vmatmul.mubr.f32.vlgmr.msra.gmra.mxu0 %v2126_v61 }
 0x453   :  { %1525 = vmatpush3.msra.mxu0 %v1786_v1  ;;  %1556 = vmatprep.mubr.msk.f32.mxu0 %vm1729_vm0, %v1728_v0 }
 0x454   :  { %1526 = vmatprep.subr.mxu0 %v1728_v0 }
 0x455   :  { %1527 = vmatpush3.msra.mxu0 %v1788_v2 }
 0x456   :  { %1528 = vmatprep.subr.mxu0 %v1728_v0 }
 0x457   :  { %1529 = vmatpush3.msra.mxu0 %v1792_v3 }
 0x458   :  { %1530 = vmatprep.subr.mxu0 %v1728_v0 }
 0x459   :  { %1531 = vmatpush3.msra.mxu0 %v1799_v5  ;;  %v855_v5 = vld [vmem:[#allocation7 + $0x70] sm:$0xff] }
 0x45a   :  { %1532 = vmatprep.subr.mxu0 %v1728_v0 }
 0x45b   :  { %1533 = vmatpush3.msra.mxu0 %v1809_v8  ;;  %v851_v8 = vld [vmem:[#allocation7 + $0x50] sm:$0xff] }
 0x45c   :  { %1534 = vmatprep.subr.mxu0 %v1728_v0 }
 0x45d   :  { %1535 = vmatpush3.msra.mxu0 %v1816_v10  ;;  %v849_v10 = vld [vmem:[#allocation7 + $0x40] sm:$0xff] }
 0x45e   :  { %1536 = vmatprep.subr.mxu0 %v1728_v0 }
 0x45f   :  { %1537 = vmatpush3.msra.mxu0 %v1822_v11  ;;  %v848_v11 = vld [vmem:[#allocation7 + $0x38] sm:$0xff] }
 0x460   :  { %1538 = vmatprep.subr.mxu0 %v1728_v0 }
 0x461   :  { %1539 = vmatpush3.msra.mxu0 %v1828_v12  ;;  %v847_v12 = vld [vmem:[#allocation7 + $0x30] sm:$0xff] }
 0x462   :  { %1540 = vmatprep.subr.mxu0 %v1728_v0 }
 0x463   :  { %1541 = vmatpush3.msra.mxu0 %v1834_v13  ;;  %v846_v13 = vld [vmem:[#allocation7 + $0x28] sm:$0xff] }
 0x464   :  { %1542 = vmatprep.subr.mxu0 %v1728_v0 }
 0x465   :  { %1543 = vmatpush3.msra.mxu0 %v1840_v14  ;;  %v845_v14 = vld [vmem:[#allocation7 + $0x20] sm:$0xff] }
 0x466   :  { %1544 = vmatprep.subr.mxu0 %v1728_v0 }
 0x467   :  { %1545 = vmatpush3.msra.mxu0 %v1846_v15  ;;  %v844_v15 = vld [vmem:[#allocation7 + $0x18] sm:$0xff] }
 0x468   :  { %1546 = vmatprep.subr.mxu0 %v1728_v0 }
 0x469   :  { %1547 = vmatpush3.msra.mxu0 %v1852_v16  ;;  %v843_v16 = vld [vmem:[#allocation7 + $0x10] sm:$0xff] }
 0x46a   :  { %1548 = vmatprep.subr.mxu0 %v1728_v0 }
 0x46b   :  { %1549 = vmatpush3.msra.mxu0 %v1858_v17  ;;  %v842_v17 = vld [vmem:[#allocation7 + $0x8] sm:$0xff] }
 0x46c   :  { %1550 = vmatprep.subr.mxu0 %v1728_v0 }
 0x46d   :  { %1551 = vmatpush3.msra.mxu0 %v1864_v18  ;;  %v841_v18 = vld [vmem:[#allocation7] sm:$0xff] }
 0x46e   :  { %1552 = vmatprep.subr.mxu0 %v1728_v0 }
 0x46f   :  { %1553 = vmatpush3.msra.mxu0 %v1870_v19  ;;  %v200_v19 = vadd.f32 %v1937_v23, %v2047_v46 }
 0x470   :  { %1554 = vmatprep.subr.mxu0 %v1728_v0  ;;  %v853_v0 = vld [vmem:[#allocation7 + $0x60] sm:$0xff] }
 0x471   :  { %1555 = vmatpush3.msra.mxu0 %v1876_v20 }
 0x512   :  { %v675_v1 = vpop.f32.mrf.mxu0 }
 0x513   :  { %v679_v2 = vadd.f32 %v675_v1, %v195_v63 }
 0x514   :  { %v1488_v3 = vpop.f32.mrf.mxu0 }
 0x515   :  { %1620 = vtanh.f32 %v679_v2 }
 0x522   :  { %v1621_v4 = vpop.eup %1620 }
 0x523   :  { %1522 = vmatmul.mubr.f32.vlgmr.msra.gmra.mxu1 %v1621_v4 }
 0x524   :  { %1560 = vmatpush3.msra.mxu1 %v856_v62  ;;  %1591 = vmatprep.mubr.f32.mxu1 %v1940_v29 }
 0x525   :  { %1561 = vmatprep.subr.mxu1 %v855_v5 }
 0x526   :  { %1562 = vmatpush3.msra.mxu1 %v855_v5 }
 0x527   :  { %1563 = vmatprep.subr.mxu1 %v854_v6 }
 0x528   :  { %1564 = vmatpush3.msra.mxu1 %v854_v6 }
 0x529   :  { %1565 = vmatprep.subr.mxu1 %v853_v0 }
 0x52a   :  { %1566 = vmatpush3.msra.mxu1 %v853_v0 }
 0x52b   :  { %1567 = vmatprep.subr.mxu1 %v852_v7 }
 0x52c   :  { %1568 = vmatpush3.msra.mxu1 %v852_v7 }
 0x52d   :  { %1569 = vmatprep.subr.mxu1 %v851_v8 }
 0x52e   :  { %1570 = vmatpush3.msra.mxu1 %v851_v8 }
 0x52f   :  { %1571 = vmatprep.subr.mxu1 %v850_v9 }
 0x530   :  { %1572 = vmatpush3.msra.mxu1 %v850_v9 }
 0x531   :  { %1573 = vmatprep.subr.mxu1 %v849_v10 }
 0x532   :  { %1574 = vmatpush3.msra.mxu1 %v849_v10 }
 0x533   :  { %1575 = vmatprep.subr.mxu1 %v848_v11 }
 0x534   :  { %1576 = vmatpush3.msra.mxu1 %v848_v11 }
 0x535   :  { %1577 = vmatprep.subr.mxu1 %v847_v12 }
 0x536   :  { %1578 = vmatpush3.msra.mxu1 %v847_v12 }
 0x537   :  { %1579 = vmatprep.subr.mxu1 %v846_v13 }
 0x538   :  { %1580 = vmatpush3.msra.mxu1 %v846_v13 }
 0x539   :  { %1581 = vmatprep.subr.mxu1 %v845_v14 }
 0x53a   :  { %1582 = vmatpush3.msra.mxu1 %v845_v14 }
 0x53b   :  { %1583 = vmatprep.subr.mxu1 %v844_v15 }
 0x53c   :  { %1584 = vmatpush3.msra.mxu1 %v844_v15 }
 0x53d   :  { %1585 = vmatprep.subr.mxu1 %v843_v16 }
 0x53e   :  { %1586 = vmatpush3.msra.mxu1 %v843_v16 }
 0x53f   :  { %1587 = vmatprep.subr.mxu1 %v842_v17 }
 0x540   :  { %1588 = vmatpush3.msra.mxu1 %v842_v17 }
 0x541   :  { %1589 = vmatprep.subr.mxu1 %v841_v18 }
 0x542   :  { %1590 = vmatpush3.msra.mxu1 %v841_v18 }
 0x543   :  { %1592 = vmatmul.mubr.f32.vlgmr.msra.gmra.mxu1 %v2004_v40 }
 0x544   :  { %1594 = vmatprep.mubr.f32.mxu1 %v2050_v51 }
 0x547   :  { %1595 = vmatmul.mubr.f32.gmra.mxu1 %v2088_v56 }
 0x548   :  { %1597 = vmatprep.mubr.f32.mxu1 %v2126_v61 }
 0x54b   :  { %1598 = vmatmul.mubr.f32.gmra.mxu1 %v1621_v4 }
 0x5e3   :  { %v750_v20 = vpop.f32.mrf.mxu1 }
 0x5e4   :  { %v754_v21 = vadd.f32 %v750_v20, %v200_v19 }
 0x5e5   :  { %v1523_v22 = vpop.f32.mrf.mxu1 }
 0x5e6   :  { %1622 = vtanh.f32 %v754_v21 }
 0x5f3   :  { %v1623_v24 = vpop.eup %1622 }
 0x5f4   :  { %1557 = vmatmul.mubr.f32.vlgmr.msra.gmra.mxu0 %v1623_v24  ;;  %1600 = vmatprep.mubr.f32.mxu1 %v1623_v24 }
 0x603   :  { %v1593_v26 = vpop.f32.mrf.mxu1 }
 0x604   :  { %v2174_v27 = vadd.f32 %v1593_v26, %v1092_v25 }
 0x605   :  { %v930_v28 = vpop.f32.mrf.mxu1 }
 0x606   :  { %971 = vmax.xlane.f32.xlu0 %v2174_v27  ;;  %v2177_v30 = vadd.f32 %v1092_v25, %v930_v28 }
 0x607   :  { %v1596_v29 = vpop.f32.mrf.mxu1 }
 0x608   :  { %v2179_v31 = vadd.f32 %v1596_v29, %v1092_v25 }
 0x609   :  { %v940_v32 = vpop.f32.mrf.mxu1 }
 0x60a   :  { %975 = vmax.xlane.f32.xlu1 %v2179_v31  ;;  %969 = vmax.xlane.f32.xlu0 %v2177_v30  ;;  %v2183_v34 = vadd.f32 %v1092_v25, %v940_v32 }
 0x60b   :  { %v1599_v33 = vpop.f32.mrf.mxu1 }
 0x60c   :  { %v2188_v37 = vadd.f32 %v1599_v33, %v1092_v25 }
 0x60d   :  { %v950_v35 = vpop.f32.mrf.mxu1 }
 0x60e   :  { %v2185_v36 = vadd.f32 %v1092_v25, %v950_v35  ;;  %973 = vmax.xlane.f32.xlu1 %v2183_v34 }
 0x610   :  { %977 = vmax.xlane.f32.xlu0 %v2185_v36 }
 0x612   :  { %979 = vmax.xlane.f32.xlu1 %v2188_v37 }
 0x68f   :  { %v2194_v43 = vpop.xlane.xlu0 %971 }
 0x690   :  { %v986_v48 = vsub.f32 %v2174_v27, %v2194_v43 }
 0x692   :  { %v995_v45 = vmul.f32 1.442695, %v986_v48 }
 0x693   :  { %v2196_v44 = vpop.xlane.xlu1 %975  ;;  %v2198_v46 = vpop.xlane.xlu0 %969 }
 0x694   :  { %v985_v23 = vsub.f32 %v2177_v30, %v2198_v46  ;;  %v988_v49 = vsub.f32 %v2179_v31, %v2196_v44 }
 0x696   :  { %v993_v51 = vmul.f32 1.442695, %v985_v23  ;;  %v999_v54 = vmul.f32 1.442695, %v988_v49 }
 0x697   :  { %v2200_v47 = vpop.xlane.xlu1 %973 }
 0x698   :  { %v987_v52 = vsub.f32 %v2183_v34, %v2200_v47 }
 0x699   :  { %v2212_v53 = vpop.xlane.xlu0 %977 }
 0x69a   :  { %v997_v56 = vmul.f32 1.442695, %v987_v52  ;;  %v989_v57 = vsub.f32 %v2185_v36, %v2212_v53 }
 0x69b   :  { %v2208_v50 = vpop.xlane.xlu1 %979 }
 0x69c   :  { %v990_v55 = vsub.f32 %v2188_v37, %v2208_v50  ;;  %v1001_v59 = vmul.f32 1.442695, %v989_v57 }
 0x69e   :  { %v1003_v58 = vmul.f32 1.442695, %v990_v55 }
 0x6b4   :  { %v825_v39 = vpop.f32.mrf.mxu0 }
 0x6b5   :  { %v829_v40 = vadd.f32 %v825_v39, %v205_v38 }
 0x6b6   :  { %v1558_v41 = vpop.f32.mrf.mxu0 }
 0x6b7   :  { %1624 = vtanh.f32 %v829_v40 }
 0x6b8   :  { %1626 = vpow2.f32 %v995_v45 }
 0x6b9   :  { %1628 = vpow2.f32 %v993_v51 }
 0x6ba   :  { %1630 = vpow2.f32 %v999_v54 }
 0x6bb   :  { %1632 = vpow2.f32 %v997_v56 }
 0x6bc   :  { %1634 = vpow2.f32 %v1003_v58 }
 0x6bd   :  { %1636 = vpow2.f32 %v1001_v59 }
 0x6c4   :  { %v1625_v42 = vpop.eup %1624 }
 0x6c5   :  { %1601 = vmatmul.mubr.f32.gmra.mxu1 %v1625_v42  ;;  %v1627_v1 = vpop.eup %1626 }
 0x6c6   :  { %v1629_v2 = vpop.eup %1628 }
 0x6c7   :  { %v1631_v3 = vpop.eup %1630 }
 0x6c8   :  { %v1633_v4 = vpop.eup %1632 }
 0x6c9   :  { %v1635_v5 = vpop.eup %1634 }
 0x6ca   :  { %v1637_v6 = vpop.eup %1636 }
 0x785   :  { %v1602_v60 = vpop.f32.mrf.mxu1 }
 0x786   :  { %v2218_v61 = vadd.f32 %v1602_v60, %v1092_v25 }
 0x787   :  { %v960_v62 = vpop.f32.mrf.mxu1 }
 0x788   :  { %v2220_v63 = vadd.f32 %v1092_v25, %v960_v62  ;;  %983 = vmax.xlane.f32.xlu1 %v2218_v61 }
 0x78a   :  { %981 = vmax.xlane.f32.xlu0 %v2220_v63 }
 0x78c   :  { %1011 = vadd.xlane.f32.xlu1 %v1627_v1 }
 0x78e   :  { %1009 = vadd.xlane.f32.xlu0 %v1629_v2 }
 0x790   :  { %1015 = vadd.xlane.f32.xlu1 %v1631_v3 }
 0x792   :  { %1013 = vadd.xlane.f32.xlu0 %v1633_v4 }
 0x794   :  { %1019 = vadd.xlane.f32.xlu1 %v1635_v5 }
 0x796   :  { %1017 = vadd.xlane.f32.xlu0 %v1637_v6 }
 0x811   :  { %v984_v0 = vpop.xlane.xlu1 %983 }
 0x812   :  { %v992_v7 = vsub.f32 %v2218_v61, %v984_v0 }
 0x813   :  { %v2225_v8 = vpop.xlane.xlu0 %981 }
 0x814   :  { %v1007_v9 = vmul.f32 1.442695, %v992_v7  ;;  %v991_v10 = vsub.f32 %v2220_v63, %v2225_v8 }
 0x815   :  { %v1012_v11 = vpop.xlane.xlu1 %1011 }
 0x816   :  { %1638 = vpow2.f32 %v1007_v9  ;;  %v1005_v12 = vmul.f32 1.442695, %v991_v10 }
 0x817   :  { %1640 = vlog2.f32 %v1012_v11  ;;  %v1010_v13 = vpop.xlane.xlu0 %1009 }
 0x818   :  { %1642 = vpow2.f32 %v1005_v12 }
 0x819   :  { %1644 = vlog2.f32 %v1010_v13  ;;  %v1016_v14 = vpop.xlane.xlu1 %1015 }
 0x81a   :  { %1646 = vlog2.f32 %v1016_v14 }
 0x81b   :  { %v1014_v15 = vpop.xlane.xlu0 %1013 }
 0x81c   :  { %1648 = vlog2.f32 %v1014_v15 }
 0x81d   :  { %v1020_v16 = vpop.xlane.xlu1 %1019 }
 0x81e   :  { %1650 = vlog2.f32 %v1020_v16 }
 0x81f   :  { %v1018_v17 = vpop.xlane.xlu0 %1017 }
 0x820   :  { %1652 = vlog2.f32 %v1018_v17 }
 0x823   :  { %v1639_v18 = vpop.eup %1638 }
 0x824   :  { %v1641_v19 = vpop.eup %1640  ;;  %1023 = vadd.xlane.f32.xlu1 %v1639_v18 }
 0x825   :  { %v1643_v20 = vpop.eup %1642  ;;  %v1028_v21 = vmul.f32 0.6931472, %v1641_v19 }
 0x826   :  { %v1645_v22 = vpop.eup %1644  ;;  %1021 = vadd.xlane.f32.xlu0 %v1643_v20 }
 0x827   :  { %v1647_v24 = vpop.eup %1646  ;;  %v1042_v25 = vadd.f32 %v1028_v21, %v2194_v43  ;;  %v1026_v26 = vmul.f32 0.6931472, %v1645_v22 }
 0x828   :  { %v1032_v28 = vmul.f32 0.6931472, %v1647_v24 }
 0x829   :  { %v1649_v29 = vpop.eup %1648  ;;  %v1050_v32 = vsub.f32 %v2174_v27, %v1042_v25  ;;  %v1041_v33 = vadd.f32 %v1026_v26, %v2198_v46 }
 0x82a   :  { %v1044_v35 = vadd.f32 %v1032_v28, %v2196_v44  ;;  %v1030_v38 = vmul.f32 0.6931472, %v1649_v29 }
 0x82b   :  { %v1651_v39 = vpop.eup %1650  ;;  %1058 = vst [vmem:[#allocation9 + $0x8] sm:$0xff] %v1050_v32  ;;  %v1049_v40 = vsub.f32 %v2177_v30, %v1041_v33 }
 0x82c   :  { %v1052_v41 = vsub.f32 %v2179_v31, %v1044_v35  ;;  %v1043_v42 = vadd.f32 %v1030_v38, %v2200_v47  ;;  %v1036_v48 = vmul.f32 0.6931472, %v1651_v39 }
 0x82d   :  { %v1653_v43 = vpop.eup %1652  ;;  %1057 = vst [vmem:[#allocation9] sm:$0xff] %v1049_v40 }
 0x82e   :  { %1060 = vst [vmem:[#allocation9 + $0x18] sm:$0xff] %v1052_v41  ;;  %v1051_v23 = vsub.f32 %v2183_v34, %v1043_v42  ;;  %v1046_v27 = vadd.f32 %v1036_v48, %v2208_v50  ;;  %v1034_v46 = vmul.f32 0.6931472, %v1653_v43 }
 0x830   :  { %1059 = vst [vmem:[#allocation9 + $0x10] sm:$0xff] %v1051_v23  ;;  %v1054_v44 = vsub.f32 %v2188_v37, %v1046_v27  ;;  %v1045_v45 = vadd.f32 %v1034_v46, %v2212_v53 }
 0x832   :  { %1062 = vst [vmem:[#allocation9 + $0x28] sm:$0xff] %v1054_v44  ;;  %v1053_v30 = vsub.f32 %v2185_v36, %v1045_v45 }
 0x834   :  { %1061 = vst [vmem:[#allocation9 + $0x20] sm:$0xff] %v1053_v30 }
 0x8ad   :  { %v1024_v31 = vpop.xlane.xlu1 %1023 }
 0x8ae   :  { %1654 = vlog2.f32 %v1024_v31 }
 0x8af   :  { %v1022_v47 = vpop.xlane.xlu0 %1021 }
 0x8b0   :  { %1656 = vlog2.f32 %v1022_v47 }
 0x8bb   :  { %v1655_v49 = vpop.eup %1654 }
 0x8bc   :  { %v1040_v51 = vmul.f32 0.6931472, %v1655_v49 }
 0x8bd   :  { %v1657_v52 = vpop.eup %1656 }
 0x8be   :  { %v1048_v34 = vadd.f32 %v1040_v51, %v984_v0  ;;  %v1038_v54 = vmul.f32 0.6931472, %v1657_v52 }
 0x8c0   :  { %v1056_v50 = vsub.f32 %v2218_v61, %v1048_v34  ;;  %v1047_v37 = vadd.f32 %v1038_v54, %v2225_v8 }
 0x8c2   :  { %1064 = vst [vmem:[#allocation9 + $0x38] sm:$0xff] %v1056_v50  ;;  %v1055_v53 = vsub.f32 %v2220_v63, %v1047_v37 }
 0x8c4   :  { %1063 = vst [vmem:[#allocation9 + $0x30] sm:$0xff] %v1055_v53 }
 0x8c5   :  { %1709 = shalt.err (!%p1706_p0)
}
 0x8c6   :  { %1076 = dma.vmem_to_hbm [thread:$0]  %s1071_s12, 1024, %s2257_s7, [#allocation6], %s1725_s27, %s1725_s27, %s1726_s28  }
 0x8c7   :  { %1722 = dma.done.wait [#allocation6], 1024  }
 0x8c8   :  { %1723 = vsyncadd [#allocation6], 4294966272 }
 0x8c9   :  { %1080 = vsyncpa [#allocation5], 1 }
 0x8ca   :  { %1081 = vsyncpa [#allocation8], 1 }
 0x8cb   :  { %1082 = vsyncpa [#allocation6], 1 }

</bundles_post_ra>
